<compile_context>
chip_gen: v6e
topology: v6e:2x2x1
jax: 0.10.0
libtpu: 0.0.40
codegen_flags: <defaults>
</compile_context>

<pallas_src>
import functools
import math

import jax
import jax.numpy as jnp
from jax.experimental import pallas as pl
from jax.experimental.pallas import tpu as pltpu


_VMEM_LIMIT_BYTES = 48 * 1024 * 1024   # explicit scoped-VMEM limit (safe on v5e/v6e/v7x)
_VMEM_BLOCK_BUDGET = 32 * 1024 * 1024  # budget for double-buffered row-blocked f32 IO


def _choose_block_rows(rows, features, n_row_blocked_arrays):
    """Largest block_rows (multiple of 8, <= 1024) whose double-buffered,
    row-blocked f32 footprint stays within the VMEM budget."""
    per_row = n_row_blocked_arrays * features * 4 * 2  # x2 for double buffering
    br = _VMEM_BLOCK_BUDGET // max(per_row, 1)
    br = max(8, min(1024, (br // 8) * 8))
    rows_padded = ((rows + 7) // 8) * 8
    return min(br, max(8, rows_padded))


def _ln_math(x, a, b, eps, features):
    """LayerNorm math on a (R, F) f32 tile. Matches the PyTorch module:
    unbiased std (ddof=1), eps added to *std* (not variance)."""
    mean = jnp.mean(x, axis=-1, keepdims=True)
    diff = x - mean
    # two-pass variance kept on purpose (numerically safer than sum/sum-sq fusion)
    var = jnp.sum(diff * diff, axis=-1, keepdims=True) * (1.0 / (features - 1))
    std = jnp.sqrt(var)
    inv = pl.reciprocal(std + eps)          # one reciprocal per row, not per element
    return diff * inv * a + b


def _layernorm_kernel(x_ref, a_ref, b_ref, o_ref, *, eps, features):
    x = x_ref[...].astype(jnp.float32)
    a = a_ref[...].astype(jnp.float32)
    b = b_ref[...].astype(jnp.float32)
    o_ref[...] = _ln_math(x, a, b, eps, features).astype(o_ref.dtype)


def _add_layernorm_kernel(x_ref, y_ref, a_ref, b_ref, h_ref, n_ref, *, eps, features):
    # h = x + y (residual);  n = LayerNorm(h).  Fuses SublayerConnection's residual
    # add with the next sublayer's norm -> one HBM pass over h instead of two.
    h = x_ref[...].astype(jnp.float32) + y_ref[...].astype(jnp.float32)
    a = a_ref[...].astype(jnp.float32)
    b = b_ref[...].astype(jnp.float32)
    h_ref[...] = h.astype(h_ref.dtype)
    n_ref[...] = _ln_math(h, a, b, eps, features).astype(n_ref.dtype)


def _add_kernel(x_ref, y_ref, o_ref):
    o_ref[...] = x_ref[...] + y_ref[...]


def _flatten_rows(x):
    features = x.shape[-1]
    rows = math.prod(x.shape[:-1]) if x.ndim > 1 else 1
    return x.reshape(rows, features), rows, features


def layer_norm(x, a_2, b_2, eps=1e-6, block_rows=None):
    """x: (..., F). a_2, b_2: (F,). Same shape/dtype out."""
    orig_shape = x.shape
    x2, rows, features = _flatten_rows(x)
    a2 = a_2.reshape(1, features)
    b2 = b_2.reshape(1, features)

    if block_rows is None:
        block_rows = _choose_block_rows(rows, features, n_row_blocked_arrays=2)
    grid = (pl.cdiv(rows, block_rows),)
    nbytes = jnp.dtype(x.dtype).itemsize
    cost = pl.CostEstimate(
        flops=5 * rows * features,
        transcendentals=2 * rows,
        bytes_accessed=2 * rows * features * nbytes + 2 * features * 4,
    )

    row_spec = pl.BlockSpec((block_rows, features), lambda i: (i, 0))
    par_spec = pl.BlockSpec((1, features), lambda i: (0, 0))

    out = pl.pallas_call(
        functools.partial(_layernorm_kernel, eps=eps, features=features),
        out_shape=jax.ShapeDtypeStruct((rows, features), x.dtype),
        grid_spec=pltpu.PrefetchScalarGridSpec(
            num_scalar_prefetch=0,
            grid=grid,
            in_specs=[row_spec, par_spec, par_spec],
            out_specs=row_spec,
        ),
        compiler_params=pltpu.CompilerParams(
            dimension_semantics=("parallel",),
            vmem_limit_bytes=_VMEM_LIMIT_BYTES),
        cost_estimate=cost,
    )(x2, a2, b2)
    return out.reshape(orig_shape)


def add_layer_norm(x, y, a_2, b_2, eps=1e-6, block_rows=None):
    """Fused SublayerConnection transition: h = x + y, n = LayerNorm(h).
    Returns (h, n), both with x's shape/dtype."""
    orig_shape = x.shape
    x2, rows, features = _flatten_rows(x)
    y2 = y.reshape(rows, features)
    a2 = a_2.reshape(1, features)
    b2 = b_2.reshape(1, features)

    if block_rows is None:
        block_rows = _choose_block_rows(rows, features, n_row_blocked_arrays=4)
    grid = (pl.cdiv(rows, block_rows),)
    nbytes = jnp.dtype(x.dtype).itemsize
    cost = pl.CostEstimate(
        flops=6 * rows * features,
        transcendentals=2 * rows,
        bytes_accessed=4 * rows * features * nbytes + 2 * features * 4,
    )

    row_spec = pl.BlockSpec((block_rows, features), lambda i: (i, 0))
    par_spec = pl.BlockSpec((1, features), lambda i: (0, 0))

    h, n = pl.pallas_call(
        functools.partial(_add_layernorm_kernel, eps=eps, features=features),
        out_shape=(jax.ShapeDtypeStruct((rows, features), x.dtype),
                   jax.ShapeDtypeStruct((rows, features), x.dtype)),
        grid_spec=pltpu.PrefetchScalarGridSpec(
            num_scalar_prefetch=0,
            grid=grid,
            in_specs=[row_spec, row_spec, par_spec, par_spec],
            out_specs=[row_spec, row_spec],
        ),
        compiler_params=pltpu.CompilerParams(
            dimension_semantics=("parallel",),
            vmem_limit_bytes=_VMEM_LIMIT_BYTES),
        cost_estimate=cost,
    )(x2, y2, a2, b2)
    return h.reshape(orig_shape), n.reshape(orig_shape)


def residual_add(x, y, block_rows=None):
    """out = x + y (residual add of the final sublayer)."""
    orig_shape = x.shape
    x2, rows, features = _flatten_rows(x)
    y2 = y.reshape(rows, features)

    if block_rows is None:
        block_rows = _choose_block_rows(rows, features, n_row_blocked_arrays=3)
    grid = (pl.cdiv(rows, block_rows),)
    nbytes = jnp.dtype(x.dtype).itemsize
    cost = pl.CostEstimate(
        flops=rows * features,
        transcendentals=0,
        bytes_accessed=3 * rows * features * nbytes,
    )

    row_spec = pl.BlockSpec((block_rows, features), lambda i: (i, 0))
    out = pl.pallas_call(
        _add_kernel,
        out_shape=jax.ShapeDtypeStruct((rows, features), x.dtype),
        grid_spec=pltpu.PrefetchScalarGridSpec(
            num_scalar_prefetch=0,
            grid=grid,
            in_specs=[row_spec, row_spec],
            out_specs=row_spec,
        ),
        compiler_params=pltpu.CompilerParams(
            dimension_semantics=("parallel",),
            vmem_limit_bytes=_VMEM_LIMIT_BYTES),
        cost_estimate=cost,
    )(x2, y2)
    return out.reshape(orig_shape)


def encoder_layer(x, x_mask, params, self_attn, feed_forward, eps=1e-6):
    """Forward of the PyTorch EncoderLayer (eval mode):
        x = x + dropout(self_attn(norm0(x), norm0(x), norm0(x), mask))
        x = x + dropout(feed_forward(norm1(x)))
    `self_attn` / `feed_forward` are the injected sub-modules (JAX callables here).
    # TODO(synk): dropout is identity (eval mode); training-mode dropout would need
    #             in-kernel pltpu.prng_* masking.
    """
    n0 = layer_norm(x, params["ln0_a"], params["ln0_b"], eps)
    attn_out = self_attn(n0, n0, n0, x_mask)
    # fused: residual add of sublayer 0 + LayerNorm of sublayer 1 in one HBM pass
    h, n1 = add_layer_norm(x, attn_out, params["ln1_a"], params["ln1_b"], eps)
    ff_out = feed_forward(n1)
    return residual_add(h, ff_out)


# ----------------------- demo injected sub-modules (plain JAX) -----------------------

def make_demo_self_attn():
    def self_attn(q, k, v, mask):
        d = q.shape[-1]
        scores = jnp.einsum("bqd,bkd->bqk", q, k) / math.sqrt(d)
        scores = jnp.where(mask == 0, -1e9, scores)
        p = jax.nn.softmax(scores, axis=-1)
        return jnp.einsum("bqk,bkd->bqd", p, v)
    return self_attn


def make_demo_feed_forward(key, d_model, d_ff):
    k1, k2 = jax.random.split(key)
    w1 = jax.random.normal(k1, (d_model, d_ff), dtype=jnp.float32) * 0.02
    w2 = jax.random.normal(k2, (d_ff, d_model), dtype=jnp.float32) * 0.02
    def ff(x):
        return jnp.maximum(x @ w1, 0.0) @ w2
    return ff


# ----------------------------- pure-JAX reference ------------------------------------

def _ref_layer_norm(x, a, b, eps):
    mean = jnp.mean(x, axis=-1, keepdims=True)
    std = jnp.sqrt(jnp.sum((x - mean) ** 2, axis=-1, keepdims=True) / (x.shape[-1] - 1))
    return a * (x - mean) / (std + eps) + b


def _ref_encoder_layer(x, mask, params, self_attn, feed_forward, eps):
    n0 = _ref_layer_norm(x, params["ln0_a"], params["ln0_b"], eps)
    h = x + self_attn(n0, n0, n0, mask)
    n1 = _ref_layer_norm(h, params["ln1_a"], params["ln1_b"], eps)
    return h + feed_forward(n1)


if __name__ == "__main__":
    key = jax.random.PRNGKey(0)
    kx, kff, kx2 = jax.random.split(key, 3)

    # small shapes; hidden = 128 keeps the kernel's last dim lane-dense
    batch, seq, hidden, d_ff = 2, 8, 128, 256
    x = jax.random.normal(kx, (batch, seq, hidden), dtype=jnp.float32)
    x_mask = jnp.ones((batch, 1, seq), dtype=jnp.float32)

    # deterministic params, matching nn.Parameter(torch.ones / torch.zeros)
    params = dict(
        ln0_a=jnp.ones((hidden,), jnp.float32),
        ln0_b=jnp.zeros((hidden,), jnp.float32),
        ln1_a=jnp.ones((hidden,), jnp.float32),
        ln1_b=jnp.zeros((hidden,), jnp.float32),
    )

    self_attn = make_demo_self_attn()
    feed_forward = make_demo_feed_forward(kff, hidden, d_ff)

    out = encoder_layer(x, x_mask, params, self_attn, feed_forward, eps=1e-6)
    out = jax.block_until_ready(out)

    ref = _ref_encoder_layer(x, x_mask, params, self_attn, feed_forward, 1e-6)
    assert jnp.allclose(out, ref, atol=1e-4, rtol=1e-4), "EncoderLayer mismatch vs reference"

    # also exercise the standalone LayerNorm kernel with a partial (masked) last block
    x2 = jax.random.normal(kx2, (3, 37, hidden), dtype=jnp.float32)
    ln = jax.block_until_ready(layer_norm(x2, params["ln0_a"], params["ln0_b"], 1e-6))
    ref_ln = _ref_layer_norm(x2, params["ln0_a"], params["ln0_b"], 1e-6)
    assert jnp.allclose(ln, ref_ln, atol=1e-5, rtol=1e-5), "LayerNorm mismatch vs reference"

    print("KERNEL_OK")
</pallas_src>

<mosaic_0001>
module attributes {stable_mosaic.version = 11 : i64} {
  func.func @_layernorm_kernel(%arg0: i32, %arg1: memref<16x128xf32, #tpu.memory_space<vmem>>, %arg2: memref<1x128xf32, #tpu.memory_space<vmem>>, %arg3: memref<1x128xf32, #tpu.memory_space<vmem>>, %arg4: memref<16x128xf32, #tpu.memory_space<vmem>>) attributes {dimension_semantics = [#tpu.dimension_semantics<parallel>], iteration_bounds = array<i64: 1>, scalar_prefetch = 0 : i64, scratch_operands = 0 : i64, tpu.core_type = #tpu.core_type<tc>, window_params = [{transform_indices = @transform_0, window_bounds = array<i64: 16, 128>}, {pipeline_mode = #tpu.pipeline_mode<synchronous>, transform_indices = @transform_1, window_bounds = array<i64: 1, 128>}, {pipeline_mode = #tpu.pipeline_mode<synchronous>, transform_indices = @transform_2, window_bounds = array<i64: 1, 128>}, {transform_indices = @transform_3, window_bounds = array<i64: 16, 128>}]} {
    %c0 = arith.constant 0 : index
    %c0_0 = arith.constant 0 : index
    %0 = vector.load %arg1[%c0, %c0_0] : memref<16x128xf32, #tpu.memory_space<vmem>>, vector<16x128xf32>
    %c0_1 = arith.constant 0 : index
    %c0_2 = arith.constant 0 : index
    %1 = vector.load %arg2[%c0_1, %c0_2] : memref<1x128xf32, #tpu.memory_space<vmem>>, vector<1x128xf32>
    %c0_3 = arith.constant 0 : index
    %c0_4 = arith.constant 0 : index
    %2 = vector.load %arg3[%c0_3, %c0_4] : memref<1x128xf32, #tpu.memory_space<vmem>>, vector<1x128xf32>
    %cst = arith.constant dense<0.000000e+00> : vector<16xf32>
    %3 = vector.multi_reduction <add>, %0, %cst [1] : vector<16x128xf32> to vector<16xf32>
    %4 = vector.shape_cast %3 : vector<16xf32> to vector<16x1xf32>
    %cst_5 = arith.constant 1.280000e+02 : f32
    %5 = vector.broadcast %cst_5 : f32 to vector<16x1xf32>
    %6 = arith.divf %4, %5 : vector<16x1xf32>
    %7 = vector.broadcast %6 : vector<16x1xf32> to vector<16x128xf32>
    %8 = arith.subf %0, %7 : vector<16x128xf32>
    %9 = arith.mulf %8, %8 : vector<16x128xf32>
    %cst_6 = arith.constant dense<0.000000e+00> : vector<16xf32>
    %10 = vector.multi_reduction <add>, %9, %cst_6 [1] : vector<16x128xf32> to vector<16xf32>
    %11 = vector.shape_cast %10 : vector<16xf32> to vector<16x1xf32>
    %cst_7 = arith.constant 0.00787401571 : f32
    %12 = vector.broadcast %cst_7 : f32 to vector<16x1xf32>
    %13 = arith.mulf %11, %12 : vector<16x1xf32>
    %14 = math.sqrt %13 : vector<16x1xf32>
    %cst_8 = arith.constant 9.99999997E-7 : f32
    %15 = vector.broadcast %cst_8 : f32 to vector<16x1xf32>
    %16 = arith.addf %14, %15 : vector<16x1xf32>
    %17 = tpu.reciprocal %16 : vector<16x1xf32> -> vector<16x1xf32>
    %18 = vector.broadcast %17 : vector<16x1xf32> to vector<16x128xf32>
    %19 = arith.mulf %8, %18 : vector<16x128xf32>
    %20 = vector.broadcast %1 : vector<1x128xf32> to vector<16x128xf32>
    %21 = arith.mulf %19, %20 : vector<16x128xf32>
    %22 = vector.broadcast %2 : vector<1x128xf32> to vector<16x128xf32>
    %23 = arith.addf %21, %22 : vector<16x128xf32>
    %c0_9 = arith.constant 0 : index
    %c0_10 = arith.constant 0 : index
    %24 = vector.load %arg4[%c0_9, %c0_10] : memref<16x128xf32, #tpu.memory_space<vmem>>, vector<16x128xf32>
    tpu.vector_store %arg4[%c0_9, %c0_10], %23 {strides = array<i32>} : memref<16x128xf32, #tpu.memory_space<vmem>>, vector<16x128xf32>,
    return
  }
  func.func @transform_0(%arg0: i32) -> (i32, i32) {
    %c0_i32 = arith.constant 0 : i32
    %c0_i32_0 = arith.constant 0 : i32
    return %arg0, %c0_i32 : i32, i32
  }
  func.func @transform_1(%arg0: i32) -> (i32, i32) {
    %c0_i32 = arith.constant 0 : i32
    %c0_i32_0 = arith.constant 0 : i32
    %c0_i32_1 = arith.constant 0 : i32
    return %c0_i32, %c0_i32_0 : i32, i32
  }
  func.func @transform_2(%arg0: i32) -> (i32, i32) {
    %c0_i32 = arith.constant 0 : i32
    %c0_i32_0 = arith.constant 0 : i32
    %c0_i32_1 = arith.constant 0 : i32
    return %c0_i32, %c0_i32_0 : i32, i32
  }
  func.func @transform_3(%arg0: i32) -> (i32, i32) {
    %c0_i32 = arith.constant 0 : i32
    %c0_i32_0 = arith.constant 0 : i32
    return %arg0, %c0_i32 : i32, i32
  }
}

</mosaic_0001>

<bundles_post_ra>
// kernel: tpu_custom_call.1
= control target key start
LH: loop header
LB: loop body
LE: loop exit
PB: predicated region body
PF: predicated region fallthrough
CT: control target
= control target key end

     0   :  { %8 = vsyncpa [#allocation3], 0  ;;  %s205_s0 = inlined_call_operand.hbm [shape: f32[16,128], index: 0, kind: input, shape index: {}]   ;;  %s206_s1 = inlined_call_operand.vmem [shape: f32[1,128], index: 1, kind: input, shape index: {}]   ;;  %s207_s2 = inlined_call_operand.vmem [shape: f32[1,128], index: 2, kind: input, shape index: {}]   ;;  %s208_s3 = inlined_call_operand.hbm [shape: f32[16,128], index: 3, kind: output, shape index: {}]  }
   0x1   :  { %9 = vsyncpa [#allocation4], 0  ;;  %s163_s12 = smov [#allocation2]  }
   0x2   :  { %s15_s13 = sshll.u32 %s163_s12, 4  ;;  %s16_s13 = int_to_ptr.vmem [resolvable:$true] %s15_s13 }
   0x3   :  { %s127_s14 = scalar_lea.vmem %s16_s13, 256  ;;  %p132_p1 = scmp.lt.s32.totalorder %s16_s13, %s16_s13 }
   0x4   :  { %p128_p0 = scmp.ne.s32.totalorder %s16_s13, %s127_s14  ;;  %p133_p2 = scmp.lt.s32.totalorder %s127_s14, %s127_s14 }
   0x6   :  { %p134_p3 = por %p133_p2, %p132_p1 }
   0x8   :  { %p135_p4 = pnand %p134_p3, %p128_p0 }
   0xa   :  { %138 = shalt.err (!%p135_p4)
}
   0xb   :  { %s164_s15 = smov 128   ;;  %s165_s16 = smov 8  }
   0xc   :  { %21 = dma.hbm_to_vmem [thread:$0]  %s205_s0, 256, %s16_s13, [#allocation3], %s164_s15, %s164_s15, %s165_s16  }
   0xd   :  { %159 = dma.done.wait [#allocation3], 256  }
   0xe   :  { %160 = vsyncadd [#allocation3], 4294967040  ;;  %v29_v0 = vld [vmem:[#allocation2] sm:$0xff]  ;;  %v30_v1 = vld [vmem:[#allocation2 + $0x8] sm:$0xff]  ;;  %s166_s22 = smov [#allocation5]  }
   0xf   :  { %33 = vadd.xlane.f32.xlu0 %v29_v0  ;;  %v105_v27 = vld [vmem:[%s206_s1] ss:$0 sm:$0xff]  ;;  %s93_s23 = sshll.u32 %s166_s22, 4  ;;  %s94_s23 = int_to_ptr.vmem [resolvable:$true] %s93_s23 }
  0x10   :  { %v106_v29 = vld [vmem:[%s207_s2] ss:$0 sm:$0xff]  ;;  %s139_s24 = scalar_lea.vmem %s94_s23, 256  ;;  %p144_p6 = scmp.lt.s32.totalorder %s94_s23, %s94_s23 }
  0x11   :  { %p140_p5 = scmp.ne.s32.totalorder %s94_s23, %s139_s24  ;;  %p145_p7 = scmp.lt.s32.totalorder %s139_s24, %s139_s24 }
  0x13   :  { %35 = vadd.xlane.f32.xlu0 %v30_v1  ;;  %p146_p8 = por %p145_p7, %p144_p6 }
  0x15   :  { %p147_p9 = pnand %p146_p8, %p140_p5 }
  0x98   :  { %v34_v2 = vpop.xlane.xlu0 %33 }
  0x99   :  { %v38_v3 = vmul.f32 0.0078125, %v34_v2 }
  0x9b   :  { %v40_v4 = vsub.f32 %v29_v0, %v38_v3 }
  0x9c   :  { %v36_v5 = vpop.xlane.xlu0 %35 }
  0x9d   :  { %v39_v6 = vmul.f32 0.0078125, %v36_v5  ;;  %v42_v7 = vmul.f32 %v40_v4, %v40_v4 }
  0x9f   :  { %v41_v8 = vsub.f32 %v30_v1, %v39_v6  ;;  %44 = vadd.xlane.f32.xlu1 %v42_v7 }
  0xa1   :  { %v43_v9 = vmul.f32 %v41_v8, %v41_v8 }
  0xa3   :  { %46 = vadd.xlane.f32.xlu1 %v43_v9 }
 0x128   :  { %v45_v10 = vpop.xlane.xlu1 %44 }
 0x129   :  { %v48_v11 = vmul.f32 0.007874016, %v45_v10 }
 0x12b   :  { %111 = vrsqrt.f32 %v48_v11  ;;  %vm52_vm0 = vcmp.eq.f32.partialorder %v48_v11, inf  ;;  %v55_v16 = vand.u32 2147483648, %v48_v11  ;;  %vm54_vm1 = vcmp.eq.f32.partialorder %v48_v11, 0.0 }
 0x12c   :  { %v47_v12 = vpop.xlane.xlu1 %46 }
 0x12d   :  { %v49_v13 = vmul.f32 0.007874016, %v47_v12 }
 0x12f   :  { %113 = vrsqrt.f32 %v49_v13  ;;  %vm59_vm2 = vcmp.eq.f32.partialorder %v49_v13, inf  ;;  %v62_v22 = vand.u32 2147483648, %v49_v13  ;;  %vm61_vm3 = vcmp.eq.f32.partialorder %v49_v13, 0.0 }
 0x138   :  { %v112_v14 = vpop.eup %111 }
 0x139   :  { %v51_v15 = vmul.f32 %v112_v14, %v48_v11 }
 0x13b   :  { %v53_v17 = vsel %vm52_vm0, %v48_v11, %v51_v15 }
 0x13c   :  { %v114_v18 = vpop.eup %113  ;;  %v56_v19 = vsel %vm54_vm1, %v55_v16, %v53_v17 }
 0x13d   :  { %v64_v20 = vadd.f32 1e-06, %v56_v19  ;;  %v58_v21 = vmul.f32 %v114_v18, %v49_v13 }
 0x13f   :  { %115 = vrcp.f32 %v64_v20  ;;  %v60_v23 = vsel %vm59_vm2, %v49_v13, %v58_v21 }
 0x140   :  { %v63_v24 = vsel %vm61_vm3, %v62_v22, %v60_v23 }
 0x141   :  { %v65_v25 = vadd.f32 1e-06, %v63_v24 }
 0x143   :  { %117 = vrcp.f32 %v65_v25 }
 0x14c   :  { %v116_v26 = vpop.eup %115 }
 0x14d   :  { %v68_v28 = vmul.f32 %v116_v26, %v40_v4 }
 0x14f   :  { %v76_v30 = vmul.f32 %v105_v27, %v68_v28 }
 0x150   :  { %v118_v31 = vpop.eup %117 }
 0x151   :  { %v69_v32 = vmul.f32 %v118_v31, %v41_v8  ;;  %v84_v33 = vadd.f32 %v106_v29, %v76_v30 }
 0x153   :  { %v77_v34 = vmul.f32 %v105_v27, %v69_v32  ;;  %86 = vst [vmem:[#allocation5] sm:$0xff] %v84_v33 }
 0x155   :  { %v85_v35 = vadd.f32 %v106_v29, %v77_v34 }
 0x157   :  { %87 = vst [vmem:[#allocation5 + $0x8] sm:$0xff] %v85_v35 }
 0x158   :  { %150 = shalt.err (!%p147_p9)
}
 0x159   :  { %99 = dma.vmem_to_hbm [thread:$0]  %s94_s23, 256, %s208_s3, [#allocation4], %s164_s15, %s164_s15, %s165_s16  }
 0x15a   :  { %161 = dma.done.wait [#allocation4], 256  }
 0x15b   :  { %162 = vsyncadd [#allocation4], 4294967040 }
 0x15c   :  { %103 = vsyncpa [#allocation3], 1 }
 0x15d   :  { %104 = vsyncpa [#allocation4], 1 }

</bundles_post_ra>
